<compile_context>
chip_gen: v7x
topology: tpu7x:2x2x1
jax: 0.10.0
libtpu: 0.0.40
codegen_flags: <defaults>
</compile_context>

<pallas_src>
import functools

import jax
import jax.numpy as jnp
from jax.experimental import pallas as pl
from jax.experimental.pallas import tpu as pltpu


def _round_up(x, m):
    return ((x + m - 1) // m) * m


def _tpu_vmem_capacity():
    try:
        return int(pltpu.get_tpu_info().vmem_capacity_bytes)
    except Exception:
        return 128 << 20    # assume a 128-MiB-VMEM part if the query fails


def _choose_feat_block(cin, feat_block, split_for_megacore):
    """Feature-slab width.  Must be a multiple of 128 (or the full cin)."""
    if feat_block is not None:
        fb = int(feat_block)
        if cin % fb == 0 and (fb % 128 == 0 or fb == cin):
            return fb
        return cin
    if split_for_megacore and cin % 128 == 0 and cin >= 512:
        for blk in (512, 256, 128):
            if cin % blk == 0 and cin // blk >= 2:
                return blk
    return cin


def _choose_node_tile(n, feat_blk, itemsize, tile_n, budget_bytes):
    """Node-axis tile (multiple of 128 so the (1, TILE_N) graph-id stream is
    lane-aligned).  Sized so the double-buffered x slabs fill budget_bytes."""
    if tile_n is None:
        t = budget_bytes // max(1, 2 * feat_blk * itemsize)
        tile_n = (t // 128) * 128
    tile_n = int(max(128, min(_round_up(int(tile_n), 128), 32768)))
    n128 = _round_up(max(int(n), 1), 128)
    return min(tile_n, n128)


# --------------------------- stage 1: pooling -------------------------------
def _pool_kernel(batch_ref, x_ref, sums_ref, *, num_graphs, tile_n, n_valid):
    """Grid (num_feat_blocks 'parallel', num_node_tiles 'arbitrary').

    Streams (TILE_N, FEAT_BLK) slabs of x and accumulates per-graph segment
    sums into the resident output block via a one-hot MXU matmul (f32 acc).
    """
    k = pl.program_id(1)                                     # node-tile index

    @pl.when(k == 0)
    def _init():
        sums_ref[...] = jnp.zeros_like(sums_ref)

    seg = batch_ref[...]                                     # [1, TILE_N] int32
    ids = jax.lax.broadcasted_iota(jnp.int32, (num_graphs, tile_n), 0)
    onehot = (ids == seg).astype(x_ref.dtype)                # [B, TILE_N]

    x_tile = x_ref[...]                                      # [TILE_N, FEAT_BLK]
    if n_valid % tile_n != 0:
        # Ragged last tile: zero the out-of-bounds rows before the matmul so
        # undefined buffer contents can never reach the accumulation.
        row = k * tile_n + jax.lax.broadcasted_iota(jnp.int32, (tile_n, 1), 0)
        x_tile = jnp.where(row < n_valid, x_tile, jnp.zeros_like(x_tile))

    # TODO(synk): for very large num_graphs (B ~ cin) the one-hot compare
    # becomes VALU-bound; switch to sorted per-graph offsets (scalar prefetch)
    # with contiguous partial sums.
    sums_ref[...] += jnp.dot(onehot, x_tile,
                             preferred_element_type=jnp.float32)


# --------------------------- stage 2: MLP head -------------------------------
def _head_kernel(sums_ref, inv_ref, *refs, num_layers):
    """mean = sums * (1/count), then the BN-folded Linear/ReLU stack."""
    out_ref = refs[-1]
    param_refs = refs[:-1]

    h = sums_ref[...] * inv_ref[...]                         # [B, Cin] mean
    # TODO(synk): F.dropout before the last Linear is identity in eval mode.
    for i in range(num_layers):
        w = param_refs[2 * i][...]
        b = param_refs[2 * i + 1][...]
        h = jnp.dot(h.astype(w.dtype), w,
                    preferred_element_type=jnp.float32) + b
        if i < num_layers - 1:
            h = jnp.maximum(h, 0.0)                          # ReLU
    out_ref[...] = h.astype(out_ref.dtype)


def _fold_bn_and_pad(params, num_layers, out_channels, eps, out_pad):
    """Fold eval-mode BatchNorm1d into the following Linear (f32) and zero-pad
    every layer's output (lane) dimension to out_pad for lane-dense stores."""
    folded = []
    idx = 0
    scale = None
    shift = None
    for i in range(num_layers):
        w = params[idx].astype(jnp.float32)                  # [Cin_i, Cout]
        b = params[idx + 1].astype(jnp.float32).reshape(1, -1)
        idx += 2
        if scale is not None:
            # y_prev = scale*relu(z_prev) + shift  =>
            #   y_prev @ W + b = relu(z_prev) @ (scale[:,None]*W) + (shift@W + b)
            b = b + shift.reshape(1, -1) @ w
            w = scale.reshape(-1, 1) * w
        if i < num_layers - 1:
            g, be, rm, rv = (p.astype(jnp.float32).reshape(-1)
                             for p in params[idx:idx + 4])
            idx += 4
            s = g * jax.lax.rsqrt(rv + eps)
            scale, shift = s, be - rm * s
        folded.append((w, b))

    padded = []
    for i, (w, b) in enumerate(folded):
        cin_i, cout_i = w.shape
        cin_p = cin_i if i == 0 else out_pad
        wp = jnp.zeros((cin_p, out_pad), jnp.float32).at[:cin_i, :cout_i].set(w)
        bp = jnp.zeros((1, out_pad), jnp.float32).at[:, :cout_i].set(b)
        padded += [wp, bp]
    return padded


def mlp_classifier_forward(x, batch, params, *, num_graphs, num_layers,
                           out_channels, eps=1e-5, tile_n=None, feat_block=None):
    """x: [N, Cin] node features (streamed in its own dtype; bf16 recommended);
    batch: [N] int graph ids; params: [W0, b0, g0, be0, rm0, rv0, ..., W_L, b_L]
    with Linear weights stored as [Cin, Cout].  Returns [num_graphs*out_ch]."""
    n, cin = x.shape
    out_pad = _round_up(out_channels, 128)
    itemsize = jnp.dtype(x.dtype).itemsize

    vmem_cap = _tpu_vmem_capacity()
    small_vmem = vmem_cap <= (64 << 20)          # v7x-class part (2 TCs, 64 MiB)

    # ---- tiny wrapper-side prep (no full HBM pass over x) ----
    counts = jnp.zeros((num_graphs,), jnp.float32).at[batch].add(1.0)
    inv_counts = (1.0 / jnp.maximum(counts, 1.0)).reshape(num_graphs, 1)
    kparams = _fold_bn_and_pad(params, num_layers, out_channels, eps, out_pad)

    # ---- stage 1: streamed one-hot segment-sum pooling ----
    feat_blk = _choose_feat_block(cin, feat_block, split_for_megacore=small_vmem)
    budget = (8 << 20) if small_vmem else (14 << 20)
    tile_n = _choose_node_tile(n, feat_blk, itemsize, tile_n, budget)
    num_feat_blocks = cin // feat_blk
    num_node_tiles = pl.cdiv(n, tile_n)

    batch2d = batch.astype(jnp.int32).reshape(1, n)
    # TODO(synk): ship graph ids as int16/int8 when cin is tiny (ids are ~6% of
    # HBM traffic at cin=32 bf16).

    b8 = _round_up(num_graphs, 8)
    est = (2 * tile_n * feat_blk * itemsize          # x double buffer
           + 2 * 8 * tile_n * 4                      # graph-id double buffer
           + 2 * b8 * feat_blk * 4                   # resident sum accumulator
           + b8 * tile_n * (4 + itemsize)            # one-hot intermediates
           + tile_n * feat_blk * itemsize            # masked-x temporary
           + b8 * feat_blk * 4)                      # matmul result
    cap = (40 << 20) if small_vmem else (100 << 20)
    vmem_pool = int(min(cap, max(24 << 20, int(1.25 * est) + (4 << 20))))

    sums = pl.pallas_call(
        functools.partial(_pool_kernel, num_graphs=num_graphs,
                          tile_n=tile_n, n_valid=n),
        grid=(num_feat_blocks, num_node_tiles),
        out_shape=jax.ShapeDtypeStruct((num_graphs, cin), jnp.float32),
        in_specs=[pl.BlockSpec((1, tile_n), lambda j, k: (0, k)),        # ids
                  pl.BlockSpec((tile_n, feat_blk), lambda j, k: (k, j))],  # x
        out_specs=pl.BlockSpec((num_graphs, feat_blk), lambda j, k: (0, j)),
        compiler_params=pltpu.CompilerParams(
            dimension_semantics=("parallel", "arbitrary"),
            vmem_limit_bytes=vmem_pool),
    )(batch2d, x)

    # ---- stage 2: mean + BN-folded MLP head (tiny, runs once) ----
    est_h = (b8 * _round_up(cin, 128) * 4
             + 2 * sum(int(p.size) * 4 for p in kparams)
             + 2 * b8 * out_pad * 4)
    vmem_head = int(min(cap, max(16 << 20, 2 * est_h + (2 << 20))))

    out = pl.pallas_call(
        functools.partial(_head_kernel, num_layers=num_layers),
        grid=(1,),
        out_shape=jax.ShapeDtypeStruct((num_graphs, out_pad), jnp.float32),
        in_specs=[pl.BlockSpec((num_graphs, cin), lambda i: (0, 0)),
                  pl.BlockSpec((num_graphs, 1), lambda i: (0, 0))]
                 + [pl.BlockSpec(p.shape, lambda i: (0, 0)) for p in kparams],
        out_specs=pl.BlockSpec((num_graphs, out_pad), lambda i: (0, 0)),
        compiler_params=pltpu.CompilerParams(
            dimension_semantics=("arbitrary",),
            vmem_limit_bytes=vmem_head),
    )(sums, inv_counts, *kparams)

    return out[:, :out_channels].reshape(-1)                 # x.view(-1)


def init_params(key, in_channels, out_channels, num_layers):
    """Linear params a la PyTorch reset_parameters(); BatchNorm running stats
    randomized (as after training) so the eval-mode BN fold is exercised."""
    params = []
    cin = in_channels
    for i in range(num_layers):
        key, kw, kb, kg, kbe, km, kv = jax.random.split(key, 7)
        bound = 1.0 / jnp.sqrt(float(cin))
        # Stored as [Cin, Cout] (transpose of PyTorch's [Cout, Cin]).
        w = jax.random.uniform(kw, (cin, out_channels), jnp.float32, -bound, bound)
        b = jax.random.uniform(kb, (1, out_channels), jnp.float32, -bound, bound)
        params += [w, b]
        if i < num_layers - 1:
            gamma = jax.random.uniform(kg, (out_channels,), jnp.float32, 0.5, 1.5)
            beta = 0.1 * jax.random.normal(kbe, (out_channels,), jnp.float32)
            rmean = 0.1 * jax.random.normal(km, (out_channels,), jnp.float32)
            rvar = jax.random.uniform(kv, (out_channels,), jnp.float32, 0.5, 1.5)
            params += [gamma, beta, rmean, rvar]
        cin = out_channels
    return params


def reference_forward(x, batch, params, *, num_graphs, num_layers, eps=1e-5):
    """Pure-JAX reference (unfused, unfolded BN) for correctness checking."""
    hp = jax.lax.Precision.HIGHEST
    xf = x.astype(jnp.float32)
    onehot = (jnp.arange(num_graphs)[:, None] == batch[None, :]).astype(jnp.float32)
    counts = jnp.maximum(onehot.sum(axis=1, keepdims=True), 1.0)
    h = jnp.dot(onehot, xf, precision=hp) / counts
    idx = 0
    for i in range(num_layers):
        w, b = params[idx], params[idx + 1]
        idx += 2
        h = jnp.dot(h, w, precision=hp) + b.reshape(1, -1)
        if i < num_layers - 1:
            g, be, rm, rv = (p.reshape(1, -1) for p in params[idx:idx + 4])
            idx += 4
            h = jnp.maximum(h, 0.0)
            h = g * (h - rm) * jax.lax.rsqrt(rv + eps) + be
    return h.reshape(-1)


if __name__ == "__main__":
    # Small synthetic problem: 500 nodes in 4 graphs of uneven size.
    GRAPH_SIZES = (100, 150, 120, 130)
    N = sum(GRAPH_SIZES)          # 500 nodes -> ragged last node tile
    B = len(GRAPH_SIZES)          # 4 graphs
    IN_CH = 256                   # 2 feature slabs of 128 -> exercises 2-D grid
    OUT_CH = 8
    NUM_LAYERS = 3

    key = jax.random.PRNGKey(0)
    kx, kp = jax.random.split(key)

    x = jax.random.normal(kx, (N, IN_CH), jnp.float32).astype(jnp.bfloat16)
    batch = jnp.concatenate(
        [jnp.full((s,), i, jnp.int32) for i, s in enumerate(GRAPH_SIZES)])

    params = init_params(kp, IN_CH, OUT_CH, NUM_LAYERS)

    out = mlp_classifier_forward(x, batch, params,
                                 num_graphs=B, num_layers=NUM_LAYERS,
                                 out_channels=OUT_CH,
                                 tile_n=128,        # 4 node tiles (last ragged)
                                 feat_block=128)    # 2 'parallel' feature slabs
    out = jax.block_until_ready(out)

    ref = reference_forward(x, batch, params,
                            num_graphs=B, num_layers=NUM_LAYERS)
    assert out.shape == (B * OUT_CH,)
    assert jnp.allclose(out, ref, atol=1e-3, rtol=1e-3), (out, ref)

    print("KERNEL_OK")
</pallas_src>

<mosaic_0001>
module attributes {stable_mosaic.version = 11 : i64} {
  func.func @_pool_kernel(%arg0: i32, %arg1: i32, %arg2: memref<1x128xi32, #tpu.memory_space<vmem>>, %arg3: memref<128x128xbf16, #tpu.memory_space<vmem>>, %arg4: memref<4x128xf32, #tpu.memory_space<vmem>>) attributes {dimension_semantics = [#tpu.dimension_semantics<parallel>, #tpu.dimension_semantics<arbitrary>], iteration_bounds = array<i64: 2, 4>, scalar_prefetch = 0 : i64, scratch_operands = 0 : i64, tpu.core_type = #tpu.core_type<tc>, window_params = [{transform_indices = @transform_0, window_bounds = array<i64: 1, 128>}, {transform_indices = @transform_1, window_bounds = array<i64: 128, 128>}, {transform_indices = @transform_2, window_bounds = array<i64: 4, 128>}]} {
    %c0_i32 = arith.constant 0 : i32
    %0 = arith.cmpi eq, %arg1, %c0_i32 : i32
    %1 = arith.extui %0 : i1 to i32
    %c0_i32_0 = arith.constant 0 : i32
    %2 = arith.cmpi ne, %1, %c0_i32_0 : i32
    scf.if %2 {
      %cst_9 = arith.constant 0.000000e+00 : f32
      %25 = vector.broadcast %cst_9 : f32 to vector<4x128xf32>
      %c0_10 = arith.constant 0 : index
      %c0_11 = arith.constant 0 : index
      %26 = vector.load %arg4[%c0_10, %c0_11] : memref<4x128xf32, #tpu.memory_space<vmem>>, vector<4x128xf32>
      tpu.vector_store %arg4[%c0_10, %c0_11], %25 {strides = array<i32>} : memref<4x128xf32, #tpu.memory_space<vmem>>, vector<4x128xf32>,
    } else {
    }
    %c0 = arith.constant 0 : index
    %c0_1 = arith.constant 0 : index
    %3 = vector.load %arg2[%c0, %c0_1] : memref<1x128xi32, #tpu.memory_space<vmem>>, vector<1x128xi32>
    %4 = tpu.iota {dimensions = array<i32: 0>} : vector<4x128xi32>
    %5 = vector.broadcast %3 : vector<1x128xi32> to vector<4x128xi32>
    %6 = arith.cmpi eq, %4, %5 : vector<4x128xi32>
    %7 = arith.extui %6 : vector<4x128xi1> to vector<4x128xi32>
    %8 = arith.sitofp %7 : vector<4x128xi32> to vector<4x128xf32>
    %9 = arith.truncf %8 : vector<4x128xf32> to vector<4x128xbf16>
    %c0_2 = arith.constant 0 : index
    %c0_3 = arith.constant 0 : index
    %10 = vector.load %arg3[%c0_2, %c0_3] : memref<128x128xbf16, #tpu.memory_space<vmem>>, vector<128x128xbf16>
    %c128_i32 = arith.constant 128 : i32
    %11 = arith.muli %arg1, %c128_i32 : i32
    %12 = tpu.iota {dimensions = array<i32: 0>} : vector<128x1xi32>
    %13 = vector.broadcast %11 : i32 to vector<128x1xi32>
    %14 = arith.addi %13, %12 : vector<128x1xi32>
    %c500_i32 = arith.constant 500 : i32
    %15 = vector.broadcast %c500_i32 : i32 to vector<128x1xi32>
    %16 = arith.cmpi slt, %14, %15 : vector<128x1xi32>
    %cst = arith.constant 0.000000e+00 : bf16
    %17 = vector.broadcast %cst : bf16 to vector<128x128xbf16>
    %18 = vector.shape_cast %16 : vector<128x1xi1> to vector<128x1xi1>
    %19 = vector.broadcast %18 : vector<128x1xi1> to vector<128x128xi1>
    %20 = arith.select %19, %10, %17 : vector<128x128xi1>, vector<128x128xbf16>
    %c0_4 = arith.constant 0 : index
    %c0_5 = arith.constant 0 : index
    %21 = vector.load %arg4[%c0_4, %c0_5] : memref<4x128xf32, #tpu.memory_space<vmem>>, vector<4x128xf32>
    %cst_6 = arith.constant dense<0.000000e+00> : vector<4x128xf32>
    %22 = tpu.matmul %9, %20, %cst_6 {dimension_numbers = #tpu.dot_dimension_numbers<[1], [0], [0], [1], [0, 0, 1, 1], [], []>} : vector<4x128xbf16>, vector<128x128xbf16>, vector<4x128xf32> -> vector<4x128xf32>
    %23 = arith.addf %21, %22 : vector<4x128xf32>
    %c0_7 = arith.constant 0 : index
    %c0_8 = arith.constant 0 : index
    %24 = vector.load %arg4[%c0_7, %c0_8] : memref<4x128xf32, #tpu.memory_space<vmem>>, vector<4x128xf32>
    tpu.vector_store %arg4[%c0_7, %c0_8], %23 {strides = array<i32>} : memref<4x128xf32, #tpu.memory_space<vmem>>, vector<4x128xf32>,
    return
  }
  func.func @transform_0(%arg0: i32, %arg1: i32) -> (i32, i32) {
    %c0_i32 = arith.constant 0 : i32
    %c0_i32_0 = arith.constant 0 : i32
    return %c0_i32, %arg1 : i32, i32
  }
  func.func @transform_1(%arg0: i32, %arg1: i32) -> (i32, i32) {
    %c0_i32 = arith.constant 0 : i32
    return %arg1, %arg0 : i32, i32
  }
  func.func @transform_2(%arg0: i32, %arg1: i32) -> (i32, i32) {
    %c0_i32 = arith.constant 0 : i32
    %c0_i32_0 = arith.constant 0 : i32
    return %c0_i32, %arg0 : i32, i32
  }
}

</mosaic_0001>

<bundles_post_ra>
// kernel: tpu_custom_call.1
= control target key start
LH: loop header
LB: loop body
LE: loop exit
PB: predicated region body
PF: predicated region fallthrough
CT: control target
= control target key end

     0   :  { %7 = vsyncpa [#allocation3], 0  ;;  %s1462_s0 = inlined_call_operand.hbm [shape: s32[1,500], index: 0, kind: input, shape index: {}]   ;;  %s1463_s1 = inlined_call_operand.hbm [shape: bf16[500,256], index: 1, kind: input, shape index: {}]   ;;  %s1464_s2 = inlined_call_operand.hbm [shape: f32[4,256], index: 2, kind: output, shape index: {}]  }
   0x1   :  { %9 = vsyncpa [#allocation3 + $0x1], 0 }
   0x2   :  { %10 = vsyncpa [#allocation6], 0 }
   0x3   :  { %12 = vsyncpa [#allocation6 + $0x1], 0 }
   0x4   :  { %13 = vsyncpa [#allocation4], 0 }
   0x5   :  { %15 = vsyncpa [#allocation4 + $0x1], 0  ;;  %s1003_s9 = smov 0   ;;  %s1005_s10 = smov 0  }
   0x6   :  { %s1007_s11 = smov 0   ;;  %s1009_s12 = smov 0  }
   0x7   :  { %s1011_s13 = smov 0   ;;  %s1013_s14 = smov 0  }
   0x8   :  { %s1015_s15 = smov 0   ;;  %s1017_s16 = smov 0  }
   0x9   :  { %s1019_s17 = smov 0   ;;  %s1021_s18 = smov 0  }
   0xa   :  { %s1023_s19 = smov 0   ;;  %s1025_s20 = smov 0  }
   0xb   :  { %s1027_s21 = smov 0   ;;  %s1029_s22 = smov 0  }
   0xc LB: > { %1473 = sst [smem:[#allocation11_spill]] %s932_s11  ;;  %s577_s23 = sadd.s32 4294967295, %s976_s22   ;;  %s976_s22 = sphi %s1029_s22, %s21_s22   ;;  %s972_s21 = sphi %s1027_s21, %s1534_s21   ;;  %s968_s20 = sphi %s1025_s20, %s1533_s20   ;;  %s964_s19 = sphi %s1023_s19, %s1532_s19   ;;  %s960_s18 = sphi %s1021_s18, %s1531_s18   ;;  %s956_s17 = sphi %s1019_s17, %s1530_s17   ;;  %s952_s16 = sphi %s1017_s16, %s1529_s16   ;;  %s948_s15 = sphi %s1015_s15, %s1528_s15   ;;  %s944_s14 = sphi %s1013_s14, %s1527_s14   ;;  %s940_s13 = sphi %s1011_s13, %s1526_s13   ;;  %s936_s12 = sphi %s1009_s12, %s1525_s12   ;;  %s932_s11 = sphi %s1007_s11, %s1516_s11   ;;  %s928_s10 = sphi %s1005_s10, %s1524_s10   ;;  %s924_s9 = sphi %s1003_s9, %s1523_s9  }
   0xd   : > { %1474 = sst [smem:[#allocation12_spill]] %s956_s17  ;;  %s30_s25 = sadd.s32 1, %s968_s20 }
   0xe   : > { %s33_s26 = sadd.s32 1, %s972_s21  ;;  %p31_p0 = scmp.ge.s32.totalorder %s30_s25, 4 }
   0xf   : > { %s40_s27 = sadd.s32 1, %s956_s17  ;;  %p47_p1 = scmp.ne.s32.totalorder %s956_s17, %s952_s16 }
  0x10   : > { %p48_p2 = scmp.eq.s32.totalorder %s976_s22, 0  ;;  %s1536_s25 = smov (%p31_p0, %s30_s25), 0 }
  0x11   : > { %1475 = sst [smem:[#allocation13_spill]] %s1536_s25  ;;  %s1538_s26 = smov (!%p31_p0, %s33_s26), %s972_s21 }
  0x12   : > { %s37_s28 = ssub.s32 %s968_s20, %s1536_s25  ;;  %p1086_p3 = por %p48_p2, %p47_p1 }
  0x13   : > { %p35_p4 = scmp.ge.s32.totalorder %s1538_s26, 2  ;;  %p38_p5 = scmp.eq.s32.totalorder %s37_s28, 0 }
  0x14   : > { %p53_p6 = scmp.ne.s32.totalorder %s952_s16, %s948_s15  ;;  %p1093_p7 = scmp.eq.s32.totalorder %s577_s23, 0 }
  0x15   : > { %s1540_s26 = smov (%p35_p4, %s1538_s26), 0  ;;  %s68_s7 = sadd.s32 1, %s944_s14 }
  0x16   : > { %1478 = sst [smem:[#allocation14_spill]] %s1540_s26  ;;  %p1104_p8 = por %p1093_p7, %p53_p6 }
  0x17   : > { %s1100_s3 = scalar_select %p38_p5, %s956_s17, %s40_s27  }
  0x18   : > { %s1480_s4 = scalar_select %p1104_p8, 1, 0 }
  0x19   : > { %1479 = sst [smem:[#allocation15_spill]] %s1100_s3  ;;  %s64_s5 = ssub.s32 %s972_s21, %s1540_s26 }
  0x1a   : > { %s65_s6 = sor.u32 %s64_s5, %s37_s28  ;;  %p75_p10 = scmp.ne.s32.totalorder %s944_s14, %s940_s13 }
  0x1b   : > { %p66_p9 = scmp.eq.s32.totalorder %s65_s6, 0  ;;  %p81_p11 = scmp.ne.s32.totalorder %s940_s13, %s936_s12 }
  0x1c   : > { %p92_p12 = scmp.eq.s32.totalorder %s64_s5, 0  ;;  %p1120_p13 = por %p75_p10, %p48_p2 }
  0x1d   : > { %s1116_s8 = scalar_select %p66_p9, %s944_s14, %s68_s7  }
  0x1e   : > { %s1482_s15 = scalar_select %p1120_p13, 1, 0 }
  0x1f   : > { %1481 = sst [smem:[#allocation16_spill]] %s1116_s8  ;;  %p1126_p0 = por %p81_p11, %p1093_p7 }
  0x20   : > { %s94_s24 = sadd.s32 1, %s932_s11  ;;  %p104_p1 = scmp.ne.s32.totalorder %s932_s11, %s928_s10 }
  0x21   : > { %s1483_s27 = scalar_select %p1126_p0, 1, 0 }
  0x22   : > { %s1134_s28 = scalar_select %p92_p12, %s932_s11, %s94_s24  }
  0x23   : > { %p105_p4 = scmp.eq.s32.totalorder %s577_s23, 7  ;;  %p110_p5 = scmp.ne.s32.totalorder %s928_s10, %s924_s9 }
  0x24   : > { %1484 = sst [smem:[#allocation17_spill]] %s1134_s28  ;;  %s1485_s12 = sadd.s32 4294967294, %s976_s22  }
  0x25   : > { %p111_p6 = scmp.eq.s32.totalorder %s1485_s12, 7  ;;  %p1142_p9 = por %p105_p4, %p104_p1 }
  0x26   : > { %p580_p7 = scmp.ge.s32.totalorder %s976_s22, 8 }
  0x27   : > { %s1486_s5 = scalar_select %p1142_p9, 1, 0 }
  0x28   : > { %p1146_p2 = por %p111_p6, %p110_p5  ;;  %127 = sbr.rel (%p580_p7) target bundleno = 106 (0x6a), region = 16 }
  0x29   : > { %s131_s24 = sand.u32 (!%p580_p7), 1, %s956_s17   ;;  %s1470_s23 = sshll.u32 (!%p580_p7), %s968_s20, 4 }
  0x2a   : > { %s1487_s6 = scalar_select %p1146_p2, 1, 0 }
  0x2b   : > { %s1158_s12 = scalar_lea.hbm (!%p580_p7), %s1462_s0, %s1470_s23  ;;  %s134_s26 = scalar_lea.vmem (!%p580_p7), [#allocation2], %s131_s24 }
  0x2c   : > { %s141_s25 = sshll.u32 (!%p580_p7), %s134_s26, 4  ;;  %s132_s3 = scalar_lea.sflag (!%p580_p7), [#allocation3], %s131_s24  ;;  %s142_s25 = int_to_ptr.vmem [resolvable:$true] %s141_s25 }
  0x2d   : > { %s770_s8 = scalar_lea.hbm (!%p580_p7), %s1158_s12, 16  ;;  %s774_s11 = scalar_lea.hbm (!%p580_p7), %s1462_s0, 64 }
  0x2e   : > { %p771_p10 = scmp.ne.s32.totalorder (!%p580_p7), %s1158_s12, %s770_s8  ;;  %p775_p1 = scmp.lt.u32.totalorder (!%p580_p7), %s1158_s12, %s1462_s0 }
  0x2f   : > { %p776_p4 = scmp.lt.u32.totalorder %s774_s11, %s770_s8  ;;  %p778_p6 = scmp.lt.u32.totalorder %s770_s8, %s1158_s12 }
  0x30   : > { %p772_p11 = pnand %p771_p10, %p1086_p3 }
  0x31   : > { %p777_p5 = por %p776_p4, %p775_p1 }
  0x32   : > { %p773_p12 = pneg %p772_p11 }
  0x33   : > { %p779_p7 = por %p778_p6, %p777_p5 }
  0x35   : > { %p780_p2 = pnand %p779_p7, %p773_p12 }
  0x37   : > { %783 = shalt.err (!%p780_p2)
}
  0x38   : > { %s784_s26 = scalar_lea.vmem %s142_s25, 16  ;;  %s978_s24 = smov [#allocation2]  }
  0x39   : > { %p785_p9 = scmp.ne.s32.totalorder %s142_s25, %s784_s26  ;;  %s788_s23 = sshll.u32 %s978_s24, 4  ;;  %s789_s23 = int_to_ptr.vmem [resolvable:$false] %s788_s23 }
  0x3a   : > { %s790_s17 = scalar_lea.vmem %s789_s23, 32  ;;  %p791_p0 = scmp.lt.s32.totalorder %s142_s25, %s789_s23 }
  0x3b   : > { %p786_p10 = pnand %p785_p9, %p1086_p3  ;;  %p792_p8 = scmp.lt.s32.totalorder %s790_s17, %s784_s26 }
  0x3d   : > { %p787_p11 = pneg %p786_p10  ;;  %p793_p13 = por %p792_p8, %p791_p0 }
  0x3f   : > { %p794_p1 = pnand %p793_p13, %p787_p11 }
  0x41   : > { %797 = shalt.err (!%p794_p1)
}
  0x42   : > { %641 = dma.hbm_to_vmem [thread:$0]  (%p1086_p3), %s1158_s12, 16, %s142_s25, %s132_s3  }
  0x43   : > { %p1488_p2 = scmp.ne.s32.totalorder %s1482_s15, 0 }
  0x44   : > { %s148_s11 = sand.u32 (%p1488_p2), 1, %s944_s14   ;;  %s1489_s8 = sshll.u32 (%p1488_p2), %s968_s20, 4 }
  0x45   : > { %147 = sbr.rel (!%p1488_p2) target bundleno = 106 (0x6a), region = 24  ;;  %s154_s28 = ssub.s32 (%p1488_p2), 63, %s1489_s8 }
  0x46   : > { %s582_s30 = sshll.u32 (%p1488_p2), %s148_s11, 6  ;;  %p155_p9 = scmp.lt.s32.totalorder (%p1488_p2), %s154_s28, 16 }
  0x47   : > { %s1185_s26 = scalar_lea.sflag (%p1488_p2), [#allocation6], %s148_s11  ;;  %s152_s29 = scalar_lea.vmem (%p1488_p2), [#allocation5], %s582_s30 }
  0x4c   : > { %s1542_s28 = smov (!%p155_p9, %s154_s28), 16 }
  0x4d   : > { %s1182_s23 = sshll.u32 %s1542_s28, 6 }
  0x4e   : > { %s159_s7 = ssub.s32 1024, %s1182_s23 }
  0x4f   : > { %160 = vsyncadd %s1185_s26, %s159_s7  ;;  %p585_p3 = scmp.ne.s32.totalorder %s1182_s23, 0  ;;  %s611_s25 = sshll.u32 %s968_s20, 5 }
  0x50   : > { %s163_s3 = sadd.s32 %s972_s21, %s611_s25  ;;  %s167_s15 = sshll.u32 %s152_s29, 4  ;;  %s1191_s15 = int_to_ptr.vmem [resolvable:$true] %s167_s15 }
  0x51   : > { %s587_s12 = sshll.u32 %s163_s3, 6  ;;  %s802_s7 = scalar_lea.hbm %s1463_s1, 8064 }
  0x52   : > { %s1196_s11 = scalar_lea.hbm %s1463_s1, %s587_s12 }
  0x53   : > { %s798_s8 = scalar_lea.hbm %s1196_s11, %s1182_s23  ;;  %p803_p12 = scmp.lt.u32.totalorder %s1196_s11, %s1463_s1 }
  0x54   : > { %p799_p8 = scmp.ne.s32.totalorder %s1196_s11, %s798_s8  ;;  %p804_p4 = scmp.lt.u32.totalorder %s802_s7, %s798_s8 }
  0x55   : > { %p806_p6 = scmp.lt.u32.totalorder %s798_s8, %s1196_s11 }
  0x56   : > { %p800_p13 = pnand %p799_p8, %p585_p3  ;;  %p805_p5 = por %p804_p4, %p803_p12 }
  0x58   : > { %p801_p0 = pneg %p800_p13  ;;  %p807_p7 = por %p806_p6, %p805_p5 }
  0x5a   : > { %p808_p10 = pnand %p807_p7, %p801_p0 }
  0x5c   : > { %811 = shalt.err (!%p808_p10)
}
  0x5d   : > { %s812_s3 = scalar_lea.vmem %s1191_s15, %s1182_s23  ;;  %s979_s12 = smov [#allocation5]  }
  0x5e   : > { %p813_p11 = scmp.ne.s32.totalorder %s1191_s15, %s812_s3  ;;  %s816_s24 = sshll.u32 %s979_s12, 4  ;;  %s817_s24 = int_to_ptr.vmem [resolvable:$false] %s816_s24 }
  0x5f   : > { %s818_s17 = scalar_lea.vmem %s817_s24, 2048  ;;  %p819_p9 = scmp.lt.s32.totalorder %s1191_s15, %s817_s24 }
  0x60   : > { %p814_p1 = pnand %p813_p11, %p585_p3  ;;  %p820_p8 = scmp.lt.s32.totalorder %s818_s17, %s812_s3 }
  0x62   : > { %p815_p2 = pneg %p814_p1  ;;  %p821_p13 = por %p820_p8, %p819_p9 }
  0x64   : > { %p822_p12 = pnand %p821_p13, %p815_p2 }
  0x66   : > { %825 = shalt.err (!%p822_p12)
}
  0x67   : > { %s980_s8 = smov 128   ;;  %s981_s28 = smov 64  }
  0x68   : > { %s982_s30 = smov 4  }
  0x69   : > { %173 = dma.hbm_to_vmem [thread:$0]  (%p585_p3), %s1196_s11, %s1182_s23, %s1191_s15, %s1185_s26, %s980_s8, %s981_s28, %s982_s30  }
  0x6a PF: > { %p590_p0 = scmp.ge.s32.totalorder %s976_s22, 1  ;;  %p175_p4 = scmp.lt.s32.totalorder %s976_s22, 9 }
  0x6c   : > { %p176_p5 = pnand %p590_p0, %p175_p4 }
  0x6d   : > { %s181_s7 = sand.u32 (!%p176_p5), 1, %s952_s16   ;;  %p1490_p6 = scmp.ne.s32.totalorder (!%p176_p5), %s1480_s4, 0 }
  0x6e   : > { %179 = sbr.rel (%p176_p5) target bundleno = 403 (0x193), region = 28  ;;  %s182_s29 = scalar_lea.sflag (!%p176_p5), [#allocation3], %s181_s7 }
  0x6f   : > { %s1226_s25 = scalar_lea.vmem (!%p176_p5), [#allocation2], %s181_s7 }
  0x75   : > { %911 = dma.done.wait (%p1490_p6), %s182_s29, 16  }
  0x76   : > { %913 = vsyncadd (%p1490_p6), %s182_s29, 4294967280  ;;  %s189_s23 = sand.u32 1, %s940_s13   ;;  %p1491_p3 = scmp.ne.s32.totalorder %s1483_s27, 0 }
  0x77   : > { %s591_s26 = sshll.u32 %s189_s23, 6  ;;  %s190_s15 = scalar_lea.sflag [#allocation6], %s189_s23 }
  0x78   : > { %s1233_s11 = scalar_lea.vmem [#allocation5], %s591_s26 }
  0x79   : > { %915 = dma.done.wait (%p1491_p3), %s190_s15, 1024  }
  0x7a   : > { %917 = vsyncadd (%p1491_p3), %s190_s15, 4294966272  ;;  %s215_s3 = sand.u32 1, %s928_s10   ;;  %p593_p7 = scmp.ne.s32.totalorder %s960_s18, 0 }
  0x7b   : > { %s592_s12 = sshll.u32 %s215_s3, 2  ;;  %v983_v0 = vmov (!%p593_p7), 0.0  }
  0x7c   : > { %s1242_s24 = scalar_lea.vmem [#allocation7], %s592_s12  ;;  %227 = sbr.rel (%p593_p7) target bundleno = 131 (0x83), region = 40 }
  0x7d   : > { %228 = vst [vmem:[%s1242_s24] sm:$0xf] (!%p593_p7), %v983_v0 }
  0x83 PF: > { %v230_v1 = vlaneseq  ;;  %s596_s4 = sshll.u32 %s960_s18, 7  ;;  %v984_v2 = vmov 0.0   ;;  %vm985_vm0 = vmmov 0   ;;  %v240_v9 = vld [vmem:[%s1233_s11] sm:$0xf]  ;;  %s608_s18 = sshll.u32 %s964_s19, 6 }
  0x84   : > { %621 = vmatprep.subr.bf16.mxu0 %v984_v2  ;;  %v1248_v3 = vstv %s596_s4  ;;  %637 = vmatprep.mubr.msk.bf16.mxu0 %vm985_vm0, %v984_v2  ;;  %v241_v17 = vld [vmem:[%s1233_s11 + $0x4] sm:$0xf]  ;;  %v242_v24 = vld [vmem:[%s1233_s11 + $0x8] sm:$0xf]  ;;  %v243_v25 = vld [vmem:[%s1233_s11 + $0xc] sm:$0xf]  ;;  %s1382_s28 = scalar_lea.hbm %s1464_s2, %s608_s18 }
  0x85   : > { %v1250_v4 = vshrl.u32 %v230_v1, 7  ;;  %v244_v28 = vld [vmem:[%s1233_s11 + $0x10] sm:$0xf]  ;;  %v245_v33 = vld [vmem:[%s1233_s11 + $0x14] sm:$0xf]  ;;  %s474_s27 = sshll.u32 %s1242_s24, 4  ;;  %s1384_s27 = int_to_ptr.vmem [resolvable:$true] %s474_s27 }
  0x86   : > { %v246_v44 = vld [vmem:[%s1233_s11 + $0x18] sm:$0xf]  ;;  %v247_v45 = vld [vmem:[%s1233_s11 + $0x1c] sm:$0xf]  ;;  %v248_v55 = vld [vmem:[%s1233_s11 + $0x20] sm:$0xf] }
  0x87   : > { %v257_v5 = vadd.s32 8, %v1250_v4  ;;  %v273_v6 = vadd.s32 %v1248_v3, %v1250_v4  ;;  %v258_v7 = vadd.s32 16, %v1250_v4  ;;  %v259_v8 = vadd.s32 24, %v1250_v4  ;;  %v249_v56 = vld [vmem:[%s1233_s11 + $0x24] sm:$0xf]  ;;  %s461_s30 = scalar_lea.sflag [#allocation4], %s215_s3 }
  0x88   : > { %v260_v10 = vadd.s32 32, %v1250_v4  ;;  %v261_v11 = vadd.s32 40, %v1250_v4  ;;  %v262_v12 = vadd.s32 48, %v1250_v4  ;;  %v263_v13 = vadd.s32 56, %v1250_v4  ;;  %v254_v18 = vld [vmem:[%s1233_s11 + $0x38] sm:$0xf] }
  0x89   : > { %v274_v14 = vadd.s32 %v1248_v3, %v257_v5  ;;  %vm289_vm1 = vcmp.lt.s32.totalorder %v273_v6, 500  ;;  %v275_v15 = vadd.s32 %v1248_v3, %v258_v7  ;;  %v276_v16 = vadd.s32 %v1248_v3, %v259_v8  ;;  %v250_v5 = vld [vmem:[%s1233_s11 + $0x28] sm:$0xf]  ;;  %v251_v6 = vld [vmem:[%s1233_s11 + $0x2c] sm:$0xf]  ;;  %s826_s19 = scalar_lea.vmem %s1384_s27, 64 }
  0x8a   : > { %vm1267_vm2 = vmpackc.low %vm289_vm1, %vm289_vm1  ;;  %v277_v19 = vadd.s32 %v1248_v3, %v260_v10  ;;  %v278_v20 = vadd.s32 %v1248_v3, %v261_v11  ;;  %v279_v21 = vadd.s32 %v1248_v3, %v262_v12  ;;  %v280_v22 = vadd.s32 %v1248_v3, %v263_v13  ;;  %p827_p10 = scmp.ne.s32.totalorder %s1384_s27, %s826_s19  ;;  %p1512_p11 = scmp.ne.s32.totalorder %s1486_s5, 0 }
  0x8b   : > { %vm290_vm3 = vcmp.lt.s32.totalorder %v274_v14, 500  ;;  %v353_v23 = vsel %vm1267_vm2, %v240_v9, 0  ;;  %vm291_vm4 = vcmp.lt.s32.totalorder %v275_v15, 500  ;;  %vm292_vm5 = vcmp.lt.s32.totalorder %v276_v16, 500  ;;  %v252_v14 = vld [vmem:[%s1233_s11 + $0x30] sm:$0xf] }
  0x8c   : > { %vm338_vm6 = vmpackc.low %vm290_vm3, %vm290_vm3  ;;  %vm293_vm7 = vcmp.lt.s32.totalorder %v277_v19, 500  ;;  %vm294_vm8 = vcmp.lt.s32.totalorder %v278_v20, 500  ;;  %vm295_vm10 = vcmp.lt.s32.totalorder %v279_v21, 500  ;;  %v264_v29 = vadd.s32 64, %v1250_v4  ;;  %v253_v15 = vld [vmem:[%s1233_s11 + $0x34] sm:$0xf]  ;;  %p828_p1 = pnand %p827_p10, %p1512_p11 }
  0x8d   : > { %v354_v26 = vsel %vm338_vm6, %v241_v17, 0  ;;  %vm1279_vm9 = vmpackc.low %vm291_vm4, %vm291_vm4  ;;  %v265_v30 = vadd.s32 72, %v1250_v4  ;;  %vm296_vm12 = vcmp.lt.s32.totalorder %v280_v22, 500  ;;  %v266_v34 = vadd.s32 80, %v1250_v4  ;;  %v255_v19 = vld [vmem:[%s1233_s11 + $0x3c] sm:$0xf] }
  0x8e   : > { %v597_v31 = vcombine.low %v353_v23, %v354_v26  ;;  %vm340_vm11 = vmpackc.low %vm292_vm5, %vm292_vm5  ;;  %v355_v32 = vsel %vm1279_vm9, %v242_v24, 0  ;;  %v281_v37 = vadd.s32 %v1248_v3, %v264_v29  ;;  %v267_v39 = vadd.s32 88, %v1250_v4  ;;  %v594_v23 = vld [vmem:[%s1226_s25] ss:$0 sm:$0xff]  ;;  %v369_v26 = vld [vmem:[%s1242_s24] sm:$0xf]  ;;  %p829_p2 = pneg %p828_p1 }
  0x8f   : > { %v356_v35 = vsel %vm340_vm11, %v243_v25, 0  ;;  %vm1290_vm13 = vmpackc.low %vm293_vm7, %vm293_vm7  ;;  %v282_v38 = vadd.s32 %v1248_v3, %v265_v30  ;;  %v283_v47 = vadd.s32 %v1248_v3, %v266_v34  ;;  %v268_v48 = vadd.s32 96, %v1250_v4  ;;  %s987_s7 = smov [#allocation7]  }
  0x90   : > { %622 = vmatpush3.bf16.msra.mxu0 %v597_v31  ;;  %v598_v40 = vcombine.low %v355_v32, %v356_v35  ;;  %vm342_vm14 = vmpackc.low %vm294_vm8, %vm294_vm8  ;;  %v357_v41 = vsel %vm1290_vm13, %v244_v28, 0  ;;  %vm297_vm1 = vcmp.lt.s32.totalorder %v281_v37, 500  ;;  %v284_v49 = vadd.s32 %v1248_v3, %v267_v39  ;;  %s830_s29 = sshll.u32 %s987_s7, 4  ;;  %s831_s29 = int_to_ptr.vmem [resolvable:$false] %s830_s29 }
  0x91   : > { %623 = vmatprep.subr.bf16.mxu0 %v984_v2  ;;  %v358_v42 = vsel %vm342_vm14, %v245_v33, 0  ;;  %vm1304_vm15 = vmpackc.low %vm295_vm10, %vm295_vm10  ;;  %vm298_vm2 = vcmp.lt.s32.totalorder %v282_v38, 500  ;;  %v269_v50 = vadd.s32 104, %v1250_v4  ;;  %vm299_vm5 = vcmp.lt.s32.totalorder %v283_v47, 500  ;;  %s832_s25 = scalar_lea.vmem %s831_s29, 128  ;;  %p833_p9 = scmp.lt.s32.totalorder %s1384_s27, %s831_s29 }
  0x92   : > { %vm1312_vm0 = vmpackc.low %vm296_vm12, %vm296_vm12  ;;  %v599_v51 = vcombine.low %v357_v41, %v358_v42  ;;  %v359_v52 = vsel %vm1304_vm15, %v246_v44, 0  ;;  %v285_v58 = vadd.s32 %v1248_v3, %v268_v48  ;;  %v270_v59 = vadd.s32 112, %v1250_v4  ;;  %p834_p8 = scmp.lt.s32.totalorder %s832_s25, %s826_s19 }
  0x93   : > { %v360_v53 = vsel %vm1312_vm0, %v247_v45, 0  ;;  %vm1325_vm3 = vmpackc.low %vm297_vm1, %vm297_vm1  ;;  %vm300_vm6 = vcmp.lt.s32.totalorder %v284_v49, 500  ;;  %v286_v60 = vadd.s32 %v1248_v3, %v269_v50  ;;  %v271_v61 = vadd.s32 120, %v1250_v4 }
  0x94   : > { %624 = vmatpush3.bf16.msra.mxu0 %v598_v40  ;;  %vm1331_vm4 = vmpackc.low %vm298_vm2, %vm298_vm2  ;;  %v600_v62 = vcombine.low %v359_v52, %v360_v53  ;;  %v361_v63 = vsel %vm1325_vm3, %v248_v55, 0  ;;  %vm301_vm9 = vcmp.lt.s32.totalorder %v285_v58, 500  ;;  %v287_v8 = vadd.s32 %v1248_v3, %v270_v59  ;;  %p835_p13 = por %p834_p8, %p833_p9 }
  0x95   : > { %625 = vmatprep.subr.bf16.mxu0 %v984_v2  ;;  %v362_v0 = vsel %vm1331_vm4, %v249_v56, 0  ;;  %vm1344_vm7 = vmpackc.low %vm299_vm5, %vm299_vm5  ;;  %vm302_vm10 = vcmp.lt.s32.totalorder %v286_v60, 500  ;;  %v288_v9 = vadd.s32 %v1248_v3, %v271_v61  ;;  %vm236_vm1 = vcmp.eq.s32.totalorder %v1250_v4, %v594_v23 }
  0x96   : > { %vm1350_vm8 = vmpackc.low %vm300_vm6, %vm300_vm6  ;;  %v601_v10 = vcombine.low %v361_v63, %v362_v0  ;;  %v363_v11 = vsel %vm1344_vm7, %v250_v5, 0  ;;  %vm303_vm13 = vcmp.lt.s32.totalorder %v287_v8, 500  ;;  %v986_v25 = vmov 1.0|1.0   ;;  %p836_p12 = pnand %p835_p13, %p829_p2 }
  0x97   : > { %v364_v12 = vsel %vm1350_vm8, %v251_v6, 0  ;;  %vm1361_vm11 = vmpackc.low %vm301_vm9, %vm301_vm9  ;;  %vm304_vm14 = vcmp.lt.s32.totalorder %v288_v9, 500 }
  0x98   : > { %626 = vmatpush3.bf16.msra.mxu0 %v599_v51  ;;  %vm350_vm12 = vmpackc.low %vm302_vm10, %vm302_vm10  ;;  %v602_v3 = vcombine.low %v363_v11, %v364_v12  ;;  %v365_v16 = vsel %vm1361_vm11, %v252_v14, 0 }
  0x99   : > { %627 = vmatprep.subr.bf16.mxu0 %v984_v2  ;;  %v366_v17 = vsel %vm350_vm12, %v253_v15, 0  ;;  %vm351_vm15 = vmpackc.low %vm303_vm13, %vm303_vm13 }
  0x9a   : > { %vm352_vm0 = vmpackc.low %vm304_vm14, %vm304_vm14  ;;  %v603_v20 = vcombine.low %v365_v16, %v366_v17  ;;  %v367_v21 = vsel %vm351_vm15, %v254_v18, 0 }
  0x9b   : > { %v368_v22 = vsel %vm352_vm0, %v255_v19, 0  ;;  %vm605_vm2 = vmpackc.low %vm236_vm1, %vm236_vm1 }
  0x9c   : > { %628 = vmatpush3.bf16.msra.mxu0 %v600_v62  ;;  %v604_v24 = vcombine.low %v367_v21, %v368_v22 }
  0x9d   : > { %629 = vmatprep.subr.bf16.mxu0 %v984_v2 }
  0xa0   : > { %630 = vmatpush3.bf16.msra.mxu0 %v601_v10 }
  0xa1   : > { %631 = vmatprep.subr.bf16.mxu0 %v984_v2 }
  0xa4   : > { %632 = vmatpush3.bf16.msra.mxu0 %v602_v3 }
  0xa5   : > { %633 = vmatprep.subr.bf16.mxu0 %v984_v2 }
  0xa8   : > { %634 = vmatpush3.bf16.msra.mxu0 %v603_v20 }
  0xa9   : > { %635 = vmatprep.subr.bf16.mxu0 %v984_v2 }
  0xac   : > { %636 = vmatpush3.bf16.msra.mxu0 %v604_v24 }
  0xaf   : > { %638 = vmatmul.mubr.msk.bf16.vlgmr.msra.gmra.mrb[0].mxu0 %vm605_vm2, %v986_v25 }
 0x182   : > { %v452_v27 = vpop.f32.mrb[0].mxu0 }
 0x183   : > { %v458_v28 = vadd.f32 %v452_v27, %v369_v26  ;;  %v639_v29 = vpop.f32.mrb[1].mxu0 }
 0x184   : > { %v455_v2 = vpop.f32.mrb[2].mxu0 }
 0x185   : > { %459 = vst [vmem:[%s1242_s24] sm:$0xf] %v458_v28  ;;  %v640_v4 = vpop.f32.mrb[3].mxu0 }
 0x186   : > { %839 = shalt.err (!%p836_p12)
}
 0x187   : > { %s840_s23 = scalar_lea.hbm %s1382_s28, 64  ;;  %s844_s11 = scalar_lea.hbm %s1464_s2, 128 }
 0x188   : > { %p841_p0 = scmp.ne.s32.totalorder %s1382_s28, %s840_s23  ;;  %p845_p6 = scmp.lt.u32.totalorder %s1382_s28, %s1464_s2 }
 0x189   : > { %p846_p3 = scmp.lt.u32.totalorder %s844_s11, %s840_s23  ;;  %p848_p10 = scmp.lt.u32.totalorder %s840_s23, %s1382_s28 }
 0x18a   : > { %p842_p4 = pnand %p841_p0, %p1512_p11 }
 0x18b   : > { %p847_p7 = por %p846_p3, %p845_p6 }
 0x18c   : > { %p843_p5 = pneg %p842_p4 }
 0x18d   : > { %p849_p1 = por %p848_p10, %p847_p7 }
 0x18f   : > { %p850_p2 = pnand %p849_p1, %p843_p5 }
 0x191   : > { %853 = shalt.err (!%p850_p2)
}
 0x192   : > { %644 = dma.vmem_to_hbm [thread:$0]  (%p1512_p11), %s1384_s27, 64, %s1382_s28, %s461_s30  }
 0x193 PF: > { %p650_p9 = scmp.ge.s32.totalorder %s976_s22, 2  ;;  %s486_s24 = sand.u32 1, %s924_s9  }
 0x194   : > { %p1513_p8 = scmp.ne.s32.totalorder %s1487_s6, 0  ;;  %s487_s4 = scalar_lea.sflag [#allocation4], %s486_s24 }
 0x196   : > { %p647_p13 = pnand %p650_p9, %p1513_p8 }
 0x198   : > { %919 = dma.done.wait (!%p647_p13), %s487_s4, 64  }
 0x199   : > { %921 = vsyncadd (!%p647_p13), %s487_s4, 4294967232  ;;  %s21_s22 = sadd.s32 1, %s976_s22   ;;  %s1515_s5 = sld [smem:[#allocation11_spill]] }
 0x19a   : > { %p1415_p12 = scmp.ge.s32.totalorder %s21_s22, 10   ;;  %s1516_s11 = sld [smem:[#allocation17_spill]] }
 0x19b   : > { %s1517_s27 = sld [smem:[#allocation16_spill]]  ;;  %s1518_s17 = sld [smem:[#allocation12_spill]] }
 0x19c   : > { %s1519_s8 = sld [smem:[#allocation15_spill]]  ;;  %s1520_s6 = sld [smem:[#allocation13_spill]] }
 0x19d   : > { %s1521_s28 = sld [smem:[#allocation14_spill]]  ;;  %s1523_s9 = smov %s928_s10 }
 0x19e   : > { %s1525_s12 = smov %s940_s13  ;;  %s1526_s13 = smov %s944_s14 }
 0x19f   : > { %s1524_s10 = smov %s1515_s5  ;;  %s1528_s15 = smov %s952_s16 }
 0x1a0   : > { %s1531_s18 = smov %s968_s20  ;;  %s1532_s19 = smov %s972_s21 }
 0x1a1   : > { %s1527_s14 = smov %s1517_s27  ;;  %s1529_s16 = smov %s1518_s17 }
 0x1a2   : > { %s1530_s17 = smov %s1519_s8  ;;  %s1533_s20 = smov %s1520_s6 }
 0x1a3   : > { %s1534_s21 = smov %s1521_s28  ;;  %20 = sbr.rel (!%p1415_p12) target bundleno = 12 (0xc), region = 90 }
 0x1aa   :  { %492 = vsyncpa [#allocation3], 1 }
 0x1ab   :  { %494 = vsyncpa [#allocation3 + $0x1], 1 }
 0x1ac   :  { %495 = vsyncpa [#allocation6], 1 }
 0x1ad   :  { %497 = vsyncpa [#allocation6 + $0x1], 1 }
 0x1ae   :  { %498 = vsyncpa [#allocation4], 1 }
 0x1af   :  { %500 = vsyncpa [#allocation4 + $0x1], 1 }

</bundles_post_ra>
